<compile_context>
chip_gen: v7x
topology: tpu7x:2x2x1
jax: 0.10.0
libtpu: 0.0.40
codegen_flags: <defaults>
</compile_context>

<pallas_src>
import jax
import jax.numpy as jnp
from jax.experimental import pallas as pl
from jax.experimental.pallas import tpu as pltpu

_LANE = 128
_RESIDENT_M_BUDGET = 16 << 20   # bytes for the double-buffered resident operand
_MIN_VMEM_LIMIT = 32 << 20
_MAX_VMEM_LIMIT = 60 << 20      # stay under v7x's 64 MiB physical VMEM


def _round_up(v, m):
    return ((v + m - 1) // m) * m


def _itemsize(dt):
    return jnp.dtype(dt).itemsize


def _maybe_pad2d(a, rows, cols, dtype):
    """Cast to `dtype` and zero-pad to (rows, cols); pure pass-through if already there."""
    a = a.astype(dtype)
    if a.shape == (rows, cols):
        return a                        # skip the extra N^2 HBM read+write
    return jnp.zeros((rows, cols), dtype).at[:a.shape[0], :a.shape[1]].set(a)


def _pick_tile(N, tile_n):
    if tile_n is None:
        tile_n = 512
        # Degrade for small graphs, and keep >= 2 row tiles so the "parallel"
        # row axis can shard across v7x's two TensorCores.
        while tile_n > 128 and _round_up(N, 128) < 2 * tile_n:
            tile_n //= 2
    else:
        tile_n = max(128, _round_up(tile_n, 128))
    return tile_n


def _make_reassoc_kernel(tile_n, m_resident):
    """y = (adj @ x) @ W^T + rowsum(adj) * b   (cheaper when F1 <= F2)."""
    def kernel(adj_ref, x_ref, wt_ref, b_ref, o_ref, z_acc, rs_acc):
        k = pl.program_id(1)

        @pl.when(k == 0)
        def _():
            z_acc[...] = jnp.zeros_like(z_acc)
            rs_acc[...] = jnp.zeros_like(rs_acc)

        a = adj_ref[...]
        if m_resident:
            start = pl.multiple_of(k * tile_n, tile_n)
            xk = x_ref[pl.ds(start, tile_n), :]       # slice the resident x
        else:
            xk = x_ref[...]
        z_acc[...] += jnp.dot(a, xk, preferred_element_type=jnp.float32)
        # Row-sum in f32 (bf16 row sums lose precision for large N).
        rs_acc[...] += jnp.sum(a.astype(jnp.float32), axis=1, keepdims=True)

        @pl.when(k == pl.num_programs(1) - 1)
        def _():
            y = jnp.dot(z_acc[...], wt_ref[...],
                        preferred_element_type=jnp.float32)
            o_ref[...] = y + rs_acc[...] * b_ref[...].astype(jnp.float32)

    return kernel


def _make_spmm_kernel(tile_n, m_resident):
    """o += adj_tile @ H_tile, accumulating directly into the resident f32 output."""
    def kernel(adj_ref, h_ref, o_ref):
        k = pl.program_id(1)

        @pl.when(k == 0)
        def _():
            o_ref[...] = jnp.zeros_like(o_ref)

        if m_resident:
            start = pl.multiple_of(k * tile_n, tile_n)
            hk = h_ref[pl.ds(start, tile_n), :]        # slice the resident H
        else:
            hk = h_ref[...]
        o_ref[...] += jnp.dot(adj_ref[...], hk,
                              preferred_element_type=jnp.float32)

    return kernel


def _linear_kernel(x_ref, wt_ref, b_ref, o_ref):
    """H = x @ W^T + b, computed exactly once (no per-row-tile recompute)."""
    h = jnp.dot(x_ref[...], wt_ref[...], preferred_element_type=jnp.float32)
    o_ref[...] = (h + b_ref[...].astype(jnp.float32)).astype(o_ref.dtype)
    # TODO(synk): K-tile this matmul (and the reassoc finalize) for very large
    # F1p x F2p where the resident W^T block would not fit VMEM.


def gcn_layer(x, adj, w, b, *, tile_n=None, use_bf16=False):
    """GCN layer  y = adj @ (x @ W^T + b).

    x:   [N, F1] or [B, N, F1]
    adj: [N, N]
    w:   [F2, F1]   (nn.Linear weight layout)
    b:   [F2]
    """
    if x.ndim == 3:
        # Batched branch of the original module (adj.repeat + bmm).
        # TODO(synk): fold the batch into a leading "parallel" grid axis instead
        # of a Python loop over identical-shaped 2-D calls.
        return jnp.stack(
            [gcn_layer(x[i], adj, w, b, tile_n=tile_n, use_bf16=use_bf16)
             for i in range(x.shape[0])])

    N, F1 = x.shape
    F2, F1w = w.shape
    assert F1w == F1 and adj.shape == (N, N) and b.shape == (F2,)
    out_dtype = x.dtype

    tile_n = _pick_tile(N, tile_n)
    Np = _round_up(N, tile_n)
    F1p = _round_up(F1, _LANE)
    F2p = _round_up(F2, _LANE)

    # bf16 streaming (f32 accumulation in-kernel) halves the dominant adj HBM
    # traffic and feeds the MXU at native bf16 rate.
    stream_dtype = jnp.bfloat16 if use_bf16 else x.dtype
    # TODO(synk): optional fp8 (e4m3) adj stream for v7x's MXU, gated behind an
    # accuracy-validated flag.

    # Wrapper-side layout plumbing: pre-transpose the weight once; pad/cast only
    # when actually needed.
    adjp = _maybe_pad2d(adj, Np, Np, stream_dtype)
    xp = _maybe_pad2d(x, Np, F1p, stream_dtype)
    wtp = _maybe_pad2d(w.T, F1p, F2p, stream_dtype)        # [F1p, F2p]
    bp = _maybe_pad2d(b.reshape(1, F2), 1, F2p, b.dtype)   # [1, F2p]

    grid = (Np // tile_n, Np // tile_n)    # (output-row tiles, reduction tiles)
    n_row_tiles = grid[0]

    adj_spec = pl.BlockSpec((tile_n, tile_n), lambda i, k: (i, k))
    out_spec = pl.BlockSpec((tile_n, F2p), lambda i, k: (i, 0))

    reassoc = F1 <= F2
    m_feat = F1p if reassoc else F2p
    m_dtype = stream_dtype
    # Keep the second matmul operand (x or H) resident in VMEM when its
    # double-buffered block fits the budget; otherwise re-stream it per k tile.
    m_resident = (n_row_tiles > 1 and
                  2 * Np * m_feat * _itemsize(m_dtype) <= _RESIDENT_M_BUDGET)
    if m_resident:
        m_spec = pl.BlockSpec((Np, m_feat), lambda i, k: (0, 0))
    else:
        m_spec = pl.BlockSpec((tile_n, m_feat), lambda i, k: (k, 0))

    def nbytes(r, c, dt):
        return r * c * _itemsize(dt)

    est = 2 * nbytes(tile_n, tile_n, stream_dtype)             # adj double buffer
    est += (2 * nbytes(Np, m_feat, m_dtype) if m_resident
            else 2 * nbytes(tile_n, m_feat, m_dtype))          # x or H operand
    est += 2 * nbytes(tile_n, F2p, jnp.float32)                # output block
    if reassoc:
        est += 2 * nbytes(F1p, F2p, stream_dtype)              # resident W^T
        est += 2 * nbytes(8, F2p, jnp.float32)                 # resident bias
        est += nbytes(tile_n, F1p, jnp.float32)                # z accumulator
        est += nbytes(tile_n, _LANE, jnp.float32)              # row-sum accumulator
    # TODO(synk): single-buffer the resident W^T / bias (pipeline_mode=
    # pl.Buffered(1)) to reclaim VMEM for very large feature dims on v7x.
    vmem_limit = int(min(max(est + (8 << 20), _MIN_VMEM_LIMIT), _MAX_VMEM_LIMIT))
    cparams = pltpu.CompilerParams(
        dimension_semantics=("parallel", "arbitrary"),
        vmem_limit_bytes=vmem_limit)

    if reassoc:
        kernel = _make_reassoc_kernel(tile_n, m_resident)
        yp = pl.pallas_call(
            kernel,
            out_shape=jax.ShapeDtypeStruct((Np, F2p), jnp.float32),
            grid_spec=pltpu.PrefetchScalarGridSpec(
                num_scalar_prefetch=0,
                grid=grid,
                in_specs=[adj_spec, m_spec,
                          pl.BlockSpec((F1p, F2p), lambda i, k: (0, 0)),
                          pl.BlockSpec((1, F2p), lambda i, k: (0, 0))],
                out_specs=out_spec,
                scratch_shapes=[pltpu.VMEM((tile_n, F1p), jnp.float32),
                                pltpu.VMEM((tile_n, 1), jnp.float32)],
            ),
            compiler_params=cparams,
        )(adjp, xp, wtp, bp)
    else:
        # Stage 1: H = x @ W^T + b, computed exactly once over all node rows.
        lin_est = (2 * nbytes(tile_n, F1p, stream_dtype)
                   + 2 * nbytes(F1p, F2p, stream_dtype)
                   + 2 * nbytes(8, F2p, jnp.float32)
                   + 2 * nbytes(tile_n, F2p, stream_dtype))
        lin_vmem = int(min(max(lin_est + (8 << 20), _MIN_VMEM_LIMIT),
                           _MAX_VMEM_LIMIT))
        hp = pl.pallas_call(
            _linear_kernel,
            out_shape=jax.ShapeDtypeStruct((Np, F2p), stream_dtype),
            grid_spec=pltpu.PrefetchScalarGridSpec(
                num_scalar_prefetch=0,
                grid=(Np // tile_n,),
                in_specs=[pl.BlockSpec((tile_n, F1p), lambda i: (i, 0)),
                          pl.BlockSpec((F1p, F2p), lambda i: (0, 0)),
                          pl.BlockSpec((1, F2p), lambda i: (0, 0))],
                out_specs=pl.BlockSpec((tile_n, F2p), lambda i: (i, 0)),
            ),
            compiler_params=pltpu.CompilerParams(
                dimension_semantics=("parallel",),
                vmem_limit_bytes=lin_vmem),
        )(xp, wtp, bp)

        # Stage 2: y = adj @ H, accumulated directly into the resident output.
        kernel = _make_spmm_kernel(tile_n, m_resident)
        yp = pl.pallas_call(
            kernel,
            out_shape=jax.ShapeDtypeStruct((Np, F2p), jnp.float32),
            grid_spec=pltpu.PrefetchScalarGridSpec(
                num_scalar_prefetch=0,
                grid=grid,
                in_specs=[adj_spec, m_spec],
                out_specs=out_spec,
            ),
            compiler_params=cparams,
        )(adjp, hp)

    y = yp[:N, :F2]
    return y if y.dtype == out_dtype else y.astype(out_dtype)


if __name__ == "__main__":
    key = jax.random.PRNGKey(0)

    def make_case(k, N, F1, F2):
        kx, kadj, kw, kb = jax.random.split(k, 4)
        x = jax.random.normal(kx, (N, F1), dtype=jnp.float32)
        adj = jax.random.uniform(kadj, (N, N), dtype=jnp.float32)
        bound = 1.0 / (F1 ** 0.5)   # nn.Linear-style init
        w = jax.random.uniform(kw, (F2, F1), jnp.float32, minval=-bound, maxval=bound)
        b = jax.random.uniform(kb, (F2,), jnp.float32, minval=-bound, maxval=bound)
        return x, adj, w, b

    def ref(x, adj, w, b):
        return adj @ (x @ w.T + b)

    ks = jax.random.split(key, 6)

    # Case 1: tiny, F1 < F2 -> reassociated path, single tile.
    x, adj, w, b = make_case(ks[0], 8, 16, 32)
    y = jax.block_until_ready(gcn_layer(x, adj, w, b))
    assert y.shape == (8, 32)
    assert jnp.allclose(y, ref(x, adj, w, b), atol=2e-3, rtol=2e-3)

    # Case 2: tiny, F1 > F2 -> precomputed-H (standard) path, single tile.
    x, adj, w, b = make_case(ks[1], 8, 48, 16)
    y = jax.block_until_ready(gcn_layer(x, adj, w, b))
    assert y.shape == (8, 16)
    assert jnp.allclose(y, ref(x, adj, w, b), atol=2e-3, rtol=2e-3)

    # Case 3: multi-tile reduction + padding + resident-x slicing (reassoc path).
    x, adj, w, b = make_case(ks[2], 200, 32, 64)
    y = jax.block_until_ready(gcn_layer(x, adj, w, b))
    assert y.shape == (200, 64)
    assert jnp.allclose(y, ref(x, adj, w, b), atol=5e-3, rtol=5e-3)

    # Case 4: multi-tile, F1 > F2 -> precomputed H + resident-H spmm path.
    x, adj, w, b = make_case(ks[3], 200, 64, 32)
    y = jax.block_until_ready(gcn_layer(x, adj, w, b))
    assert y.shape == (200, 32)
    assert jnp.allclose(y, ref(x, adj, w, b), atol=5e-3, rtol=5e-3)

    # Case 5: bf16 streaming mode (f32 accumulation), scale-relative check.
    x, adj, w, b = make_case(ks[4], 200, 32, 64)
    y = jax.block_until_ready(gcn_layer(x, adj, w, b, use_bf16=True))
    y_ref = ref(x, adj, w, b)
    rel = float(jnp.max(jnp.abs(y - y_ref)) / jnp.max(jnp.abs(y_ref)))
    assert rel < 2e-2, rel

    # Case 6: batched 3-D input (the module's bmm branch).
    kx, kadj, kw, kb = jax.random.split(ks[5], 4)
    xb = jax.random.normal(kx, (2, 8, 16), dtype=jnp.float32)
    adjb = jax.random.uniform(kadj, (8, 8), dtype=jnp.float32)
    wb = jax.random.uniform(kw, (8, 16), jnp.float32, minval=-0.25, maxval=0.25)
    bb = jax.random.uniform(kb, (8,), jnp.float32, minval=-0.25, maxval=0.25)
    yb = jax.block_until_ready(gcn_layer(xb, adjb, wb, bb))
    yb_ref = jnp.einsum('nm,bmf->bnf', adjb, xb @ wb.T + bb)
    assert yb.shape == (2, 8, 8)
    assert jnp.allclose(yb, yb_ref, atol=2e-3, rtol=2e-3)

    print("KERNEL_OK")
</pallas_src>

<mosaic_0001>
module attributes {stable_mosaic.version = 11 : i64} {
  func.func @kernel(%arg0: i32, %arg1: i32, %arg2: memref<128x128xf32, #tpu.memory_space<vmem>>, %arg3: memref<128x128xf32, #tpu.memory_space<vmem>>, %arg4: memref<128x128xf32, #tpu.memory_space<vmem>>, %arg5: memref<1x128xf32, #tpu.memory_space<vmem>>, %arg6: memref<128x128xf32, #tpu.memory_space<vmem>>, %arg7: memref<128x128xf32, #tpu.memory_space<vmem>>, %arg8: memref<128x1xf32, #tpu.memory_space<vmem>>) attributes {dimension_semantics = [#tpu.dimension_semantics<parallel>, #tpu.dimension_semantics<arbitrary>], iteration_bounds = array<i64: 1, 1>, scalar_prefetch = 0 : i64, scratch_operands = 2 : i64, tpu.core_type = #tpu.core_type<tc>, window_params = [{transform_indices = @transform_0, window_bounds = array<i64: 128, 128>}, {transform_indices = @transform_1, window_bounds = array<i64: 128, 128>}, {pipeline_mode = #tpu.pipeline_mode<synchronous>, transform_indices = @transform_2, window_bounds = array<i64: 128, 128>}, {pipeline_mode = #tpu.pipeline_mode<synchronous>, transform_indices = @transform_3, window_bounds = array<i64: 1, 128>}, {transform_indices = @transform_4, window_bounds = array<i64: 128, 128>}]} {
    %c0_i32 = arith.constant 0 : i32
    %0 = arith.cmpi eq, %arg1, %c0_i32 : i32
    %1 = arith.extui %0 : i1 to i32
    %c0_i32_0 = arith.constant 0 : i32
    %2 = arith.cmpi ne, %1, %c0_i32_0 : i32
    scf.if %2 {
      %cst_15 = arith.constant 0.000000e+00 : f32
      %17 = vector.broadcast %cst_15 : f32 to vector<128x128xf32>
      %c0_16 = arith.constant 0 : index
      %c0_17 = arith.constant 0 : index
      %18 = vector.load %arg7[%c0_16, %c0_17] : memref<128x128xf32, #tpu.memory_space<vmem>>, vector<128x128xf32>
      tpu.vector_store %arg7[%c0_16, %c0_17], %17 {strides = array<i32>} : memref<128x128xf32, #tpu.memory_space<vmem>>, vector<128x128xf32>,
      %cst_18 = arith.constant 0.000000e+00 : f32
      %19 = vector.broadcast %cst_18 : f32 to vector<128x1xf32>
      %c0_19 = arith.constant 0 : index
      %c0_20 = arith.constant 0 : index
      %20 = vector.load %arg8[%c0_19, %c0_20] : memref<128x1xf32, #tpu.memory_space<vmem>>, vector<128x1xf32>
      tpu.vector_store %arg8[%c0_19, %c0_20], %19 {strides = array<i32>} : memref<128x1xf32, #tpu.memory_space<vmem>>, vector<128x1xf32>,
    } else {
    }
    %c0 = arith.constant 0 : index
    %c0_1 = arith.constant 0 : index
    %3 = vector.load %arg2[%c0, %c0_1] : memref<128x128xf32, #tpu.memory_space<vmem>>, vector<128x128xf32>
    %c0_2 = arith.constant 0 : index
    %c0_3 = arith.constant 0 : index
    %4 = vector.load %arg3[%c0_2, %c0_3] : memref<128x128xf32, #tpu.memory_space<vmem>>, vector<128x128xf32>
    %c0_4 = arith.constant 0 : index
    %c0_5 = arith.constant 0 : index
    %5 = vector.load %arg7[%c0_4, %c0_5] : memref<128x128xf32, #tpu.memory_space<vmem>>, vector<128x128xf32>
    %cst = arith.constant dense<0.000000e+00> : vector<128x128xf32>
    %6 = tpu.matmul %3, %4, %cst {dimension_numbers = #tpu.dot_dimension_numbers<[1], [0], [0], [1], [0, 0, 1, 1], [], []>} : vector<128x128xf32>, vector<128x128xf32>, vector<128x128xf32> -> vector<128x128xf32>
    %7 = arith.addf %5, %6 : vector<128x128xf32>
    %c0_6 = arith.constant 0 : index
    %c0_7 = arith.constant 0 : index
    %8 = vector.load %arg7[%c0_6, %c0_7] : memref<128x128xf32, #tpu.memory_space<vmem>>, vector<128x128xf32>
    tpu.vector_store %arg7[%c0_6, %c0_7], %7 {strides = array<i32>} : memref<128x128xf32, #tpu.memory_space<vmem>>, vector<128x128xf32>,
    %c0_8 = arith.constant 0 : index
    %c0_9 = arith.constant 0 : index
    %9 = vector.load %arg8[%c0_8, %c0_9] : memref<128x1xf32, #tpu.memory_space<vmem>>, vector<128x1xf32>
    %cst_10 = arith.constant dense<0.000000e+00> : vector<128xf32>
    %10 = vector.multi_reduction <add>, %3, %cst_10 [1] : vector<128x128xf32> to vector<128xf32>
    %11 = vector.shape_cast %10 : vector<128xf32> to vector<128x1xf32>
    %12 = arith.addf %9, %11 : vector<128x1xf32>
    %c0_11 = arith.constant 0 : index
    %c0_12 = arith.constant 0 : index
    %13 = vector.load %arg8[%c0_11, %c0_12] : memref<128x1xf32, #tpu.memory_space<vmem>>, vector<128x1xf32>
    tpu.vector_store %arg8[%c0_11, %c0_12], %12 {strides = array<i32>} : memref<128x1xf32, #tpu.memory_space<vmem>>, vector<128x1xf32>,
    %c0_i32_13 = arith.constant 0 : i32
    %14 = arith.cmpi eq, %arg1, %c0_i32_13 : i32
    %15 = arith.extui %14 : i1 to i32
    %c0_i32_14 = arith.constant 0 : i32
    %16 = arith.cmpi ne, %15, %c0_i32_14 : i32
    scf.if %16 {
      %c0_15 = arith.constant 0 : index
      %c0_16 = arith.constant 0 : index
      %17 = vector.load %arg7[%c0_15, %c0_16] : memref<128x128xf32, #tpu.memory_space<vmem>>, vector<128x128xf32>
      %c0_17 = arith.constant 0 : index
      %c0_18 = arith.constant 0 : index
      %18 = vector.load %arg4[%c0_17, %c0_18] : memref<128x128xf32, #tpu.memory_space<vmem>>, vector<128x128xf32>
      %cst_19 = arith.constant dense<0.000000e+00> : vector<128x128xf32>
      %19 = tpu.matmul %17, %18, %cst_19 {dimension_numbers = #tpu.dot_dimension_numbers<[1], [0], [0], [1], [0, 0, 1, 1], [], []>} : vector<128x128xf32>, vector<128x128xf32>, vector<128x128xf32> -> vector<128x128xf32>
      %c0_20 = arith.constant 0 : index
      %c0_21 = arith.constant 0 : index
      %20 = vector.load %arg8[%c0_20, %c0_21] : memref<128x1xf32, #tpu.memory_space<vmem>>, vector<128x1xf32>
      %c0_22 = arith.constant 0 : index
      %c0_23 = arith.constant 0 : index
      %21 = vector.load %arg5[%c0_22, %c0_23] : memref<1x128xf32, #tpu.memory_space<vmem>>, vector<1x128xf32>
      %22 = vector.broadcast %20 : vector<128x1xf32> to vector<128x128xf32>
      %23 = vector.broadcast %21 : vector<1x128xf32> to vector<128x128xf32>
      %24 = arith.mulf %22, %23 : vector<128x128xf32>
      %25 = arith.addf %19, %24 : vector<128x128xf32>
      %c0_24 = arith.constant 0 : index
      %c0_25 = arith.constant 0 : index
      %26 = vector.load %arg6[%c0_24, %c0_25] : memref<128x128xf32, #tpu.memory_space<vmem>>, vector<128x128xf32>
      tpu.vector_store %arg6[%c0_24, %c0_25], %25 {strides = array<i32>} : memref<128x128xf32, #tpu.memory_space<vmem>>, vector<128x128xf32>,
    } else {
    }
    return
  }
  func.func @transform_0(%arg0: i32, %arg1: i32) -> (i32, i32) {
    %c0_i32 = arith.constant 0 : i32
    return %arg0, %arg1 : i32, i32
  }
  func.func @transform_1(%arg0: i32, %arg1: i32) -> (i32, i32) {
    %c0_i32 = arith.constant 0 : i32
    %c0_i32_0 = arith.constant 0 : i32
    return %arg1, %c0_i32 : i32, i32
  }
  func.func @transform_2(%arg0: i32, %arg1: i32) -> (i32, i32) {
    %c0_i32 = arith.constant 0 : i32
    %c0_i32_0 = arith.constant 0 : i32
    %c0_i32_1 = arith.constant 0 : i32
    return %c0_i32, %c0_i32_0 : i32, i32
  }
  func.func @transform_3(%arg0: i32, %arg1: i32) -> (i32, i32) {
    %c0_i32 = arith.constant 0 : i32
    %c0_i32_0 = arith.constant 0 : i32
    %c0_i32_1 = arith.constant 0 : i32
    return %c0_i32, %c0_i32_0 : i32, i32
  }
  func.func @transform_4(%arg0: i32, %arg1: i32) -> (i32, i32) {
    %c0_i32 = arith.constant 0 : i32
    %c0_i32_0 = arith.constant 0 : i32
    return %arg0, %c0_i32 : i32, i32
  }
}

</mosaic_0001>

<bundles_post_ra>
// kernel: tpu_custom_call.1
= control target key start
LH: loop header
LB: loop body
LE: loop exit
PB: predicated region body
PF: predicated region fallthrough
CT: control target
= control target key end

     0   :  { %9 = vsyncpa [#allocation5], 0  ;;  %s1257_s0 = inlined_call_operand.hbm [shape: f32[128,128], index: 0, kind: input, shape index: {}]   ;;  %s1258_s1 = inlined_call_operand.hbm [shape: f32[128,128], index: 1, kind: input, shape index: {}]   ;;  %s1259_s2 = inlined_call_operand.hbm [shape: f32[128,128], index: 2, kind: input, shape index: {}]   ;;  %s1260_s3 = inlined_call_operand.vmem [shape: f32[1,128], index: 3, kind: input, shape index: {}]   ;;  %s1261_s4 = inlined_call_operand.hbm [shape: f32[128,128], index: 4, kind: output, shape index: {}]  }
   0x1   :  { %10 = vsyncpa [#allocation8], 0 }
   0x2   :  { %11 = vsyncpa [#allocation6], 0  ;;  %s1080_s15 = smov [#allocation7]   ;;  %s1081_s17 = smov [#allocation4]  }
   0x3   :  { %s29_s16 = sshll.u32 %s1080_s15, 4  ;;  %s17_s18 = sshll.u32 %s1081_s17, 4  ;;  %s30_s16 = int_to_ptr.vmem [resolvable:$true] %s29_s16  ;;  %s1113_s18 = int_to_ptr.vmem [resolvable:$true] %s17_s18 }
   0x4   :  { %s986_s21 = scalar_lea.hbm %s1258_s1, 2048 }
   0x5   :  { %p987_p0 = scmp.ne.s32.totalorder %s1258_s1, %s986_s21  ;;  %p990_p1 = scmp.lt.u32.totalorder %s986_s21, %s1258_s1 }
   0x7   :  { %p992_p2 = pnand %p990_p1, %p987_p0 }
   0x9   :  { %995 = shalt.err (!%p992_p2)
}
   0xa   :  { %s996_s26 = scalar_lea.vmem %s30_s16, 2048  ;;  %p1001_p4 = scmp.lt.s32.totalorder %s30_s16, %s30_s16 }
   0xb   :  { %p997_p3 = scmp.ne.s32.totalorder %s30_s16, %s996_s26  ;;  %p1002_p5 = scmp.lt.s32.totalorder %s996_s26, %s996_s26 }
   0xd   :  { %p1003_p6 = por %p1002_p5, %p1001_p4 }
   0xf   :  { %p1004_p7 = pnand %p1003_p6, %p997_p3 }
  0x11   :  { %1007 = shalt.err (!%p1004_p7)
}
  0x12   :  { %s1082_s27 = smov 128   ;;  %s1083_s28 = smov 8  }
  0x13   :  { %35 = dma.hbm_to_vmem [thread:$0]  %s1258_s1, 2048, %s30_s16, [#allocation8], %s1082_s27, %s1082_s27, %s1083_s28  }
  0x14   :  { %s1008_s7 = scalar_lea.hbm %s1257_s0, 2048 }
  0x15   :  { %p1009_p8 = scmp.ne.s32.totalorder %s1257_s0, %s1008_s7  ;;  %p1012_p9 = scmp.lt.u32.totalorder %s1008_s7, %s1257_s0 }
  0x17   :  { %p1014_p10 = pnand %p1012_p9, %p1009_p8 }
  0x19   :  { %1017 = shalt.err (!%p1014_p10)
}
  0x1a   :  { %s1018_s12 = scalar_lea.vmem %s1113_s18, 2048  ;;  %p1023_p12 = scmp.lt.s32.totalorder %s1113_s18, %s1113_s18 }
  0x1b   :  { %p1019_p11 = scmp.ne.s32.totalorder %s1113_s18, %s1018_s12  ;;  %p1024_p13 = scmp.lt.s32.totalorder %s1018_s12, %s1018_s12 }
  0x1d   :  { %p1025_p0 = por %p1024_p13, %p1023_p12 }
  0x1f   :  { %p1026_p1 = pnand %p1025_p0, %p1019_p11 }
  0x21   :  { %1029 = shalt.err (!%p1026_p1)
}
  0x22   :  { %23 = dma.hbm_to_vmem [thread:$0]  %s1257_s0, 2048, %s1113_s18, [#allocation5], %s1082_s27, %s1082_s27, %s1083_s28  }
  0x23   :  { %s1084_s14 = smov [#allocation9]   ;;  %s1030_s19 = scalar_lea.hbm %s1259_s2, 2048 }
  0x24   :  { %s41_s15 = sshll.u32 %s1084_s14, 4  ;;  %p1031_p2 = scmp.ne.s32.totalorder %s1259_s2, %s1030_s19  ;;  %s42_s15 = int_to_ptr.vmem [resolvable:$true] %s41_s15 }
  0x25   :  { %p1034_p3 = scmp.lt.u32.totalorder %s1030_s19, %s1259_s2 }
  0x27   :  { %p1036_p4 = pnand %p1034_p3, %p1031_p2 }
  0x29   :  { %1039 = shalt.err (!%p1036_p4)
}
  0x2a   :  { %s1040_s24 = scalar_lea.vmem %s42_s15, 2048  ;;  %p1045_p6 = scmp.lt.s32.totalorder %s42_s15, %s42_s15 }
  0x2b   :  { %p1041_p5 = scmp.ne.s32.totalorder %s42_s15, %s1040_s24  ;;  %p1046_p7 = scmp.lt.s32.totalorder %s1040_s24, %s1040_s24 }
  0x2d   :  { %p1047_p8 = por %p1046_p7, %p1045_p6 }
  0x2f   :  { %p1048_p9 = pnand %p1047_p8, %p1041_p5 }
  0x31   :  { %1051 = shalt.err (!%p1048_p9)
}
  0x32   :  { %47 = dma.hbm_to_vmem [thread:$0]  %s1259_s2, 2048, %s42_s15, [#allocation8], %s1082_s27, %s1082_s27, %s1083_s28  }
  0x33   :  { %1074 = dma.done.wait [#allocation5], 2048  }
  0x34   :  { %1075 = vsyncadd [#allocation5], 4294965248 }
  0x35   :  { %1076 = dma.done.wait [#allocation8], 4096  }
  0x36   :  { %1077 = vsyncadd [#allocation8], 4294963200  ;;  %v112_v0 = vld [vmem:[#allocation7] sm:$0xff]  ;;  %v113_v1 = vld [vmem:[#allocation7 + $0x8] sm:$0xff]  ;;  %vm79_vm0 = vcmask 7168  }
  0x37   :  { %v114_v2 = vld [vmem:[#allocation7 + $0x10] sm:$0xff]  ;;  %v912_v3 = vpack.c.bf16 %v113_v1, %v112_v0  ;;  %v115_v4 = vld [vmem:[#allocation7 + $0x18] sm:$0xff]  ;;  %v116_v6 = vld [vmem:[#allocation7 + $0x20] sm:$0xff]  ;;  %v1085_v0 = vmov 0.0  }
  0x38   :  { %v916_v5 = vpack.c.bf16 %v115_v4, %v114_v2  ;;  %v117_v7 = vld [vmem:[#allocation7 + $0x28] sm:$0xff]  ;;  %v96_v9 = vld [vmem:[#allocation4] sm:$0xff]  ;;  %v118_v10 = vld [vmem:[#allocation7 + $0x30] sm:$0xff]  ;;  %80 = vst.msk [vmem:[#allocation3] sm:$0xff] %vm79_vm0, %v1085_v0 }
  0x39   :  { %913 = vmatprep.subr.bf16.mxu0 %v912_v3  ;;  %v920_v8 = vpack.c.bf16 %v117_v7, %v116_v6  ;;  %v119_v11 = vld [vmem:[#allocation7 + $0x38] sm:$0xff]  ;;  %832 = vmatprep.mubr.f32.mxu0 %v96_v9  ;;  %v1165_v12 = vld [vmem:[#allocation4 + $0x10] sm:$0xff]  ;;  %v120_v14 = vld [vmem:[#allocation7 + $0x40] sm:$0xff]  ;;  %81 = vst.msk [vmem:[#allocation3 + $0x8] sm:$0xff] %vm79_vm0, %v1085_v0 }
  0x3a   :  { %915 = vmatpush3.bf16.msra.mxu0 %v912_v3  ;;  %337 = vadd.xlane.f32.xlu0 %v96_v9  ;;  %v924_v13 = vpack.c.bf16 %v119_v11, %v118_v10  ;;  %v1168_v15 = vld [vmem:[#allocation4 + $0x8] sm:$0xff]  ;;  %v1170_v17 = vld [vmem:[#allocation4 + $0x18] sm:$0xff]  ;;  %v421_v18 = vld [vmem:[#allocation9] sm:$0xff]  ;;  %82 = vst.msk [vmem:[#allocation3 + $0x10] sm:$0xff] %vm79_vm0, %v1085_v0  ;;  %v1086_v9 = vmov 0  }
  0x3b   :  { %917 = vmatprep.subr.bf16.mxu0 %v916_v5  ;;  %341 = vadd.xlane.f32.xlu1 %v1165_v12  ;;  %v121_v16 = vld [vmem:[#allocation7 + $0x48] sm:$0xff]  ;;  %v423_v20 = vld [vmem:[#allocation9 + $0x10] sm:$0xff]  ;;  %v424_v21 = vld [vmem:[#allocation9 + $0x18] sm:$0xff]  ;;  %83 = vst.msk [vmem:[#allocation3 + $0x18] sm:$0xff] %vm79_vm0, %v1085_v0 }
  0x3c   :  { %v422_v19 = vld [vmem:[#allocation9 + $0x8] sm:$0xff]  ;;  %v948_v23 = vpack.c.bf16 %v424_v21, %v423_v20  ;;  %v928_v24 = vpack.c.bf16 %v121_v16, %v120_v14  ;;  %v1174_v25 = vld [vmem:[#allocation4 + $0x20] sm:$0xff]  ;;  %v122_v28 = vld [vmem:[#allocation7 + $0x50] sm:$0xff]  ;;  %84 = vst.msk [vmem:[#allocation3 + $0x20] sm:$0xff] %vm79_vm0, %v1085_v0  ;;  %985 = vset.pattern.permute.xlu1 %v1086_v9  ;;  %984 = vset.pattern.permute.xlu0 %v1086_v9 }
  0x3d   :  { %v944_v22 = vpack.c.bf16 %v422_v19, %v421_v18  ;;  %v425_v26 = vld [vmem:[#allocation9 + $0x20] sm:$0xff]  ;;  %v426_v27 = vld [vmem:[#allocation9 + $0x28] sm:$0xff]  ;;  %v123_v29 = vld [vmem:[#allocation7 + $0x58] sm:$0xff]  ;;  %85 = vst.msk [vmem:[#allocation3 + $0x28] sm:$0xff] %vm79_vm0, %v1085_v0 }
  0x3e   :  { %919 = vmatpush3.bf16.msra.mxu0 %v916_v5  ;;  %339 = vadd.xlane.f32.xlu0 %v1168_v15  ;;  %v1176_v30 = vld [vmem:[#allocation4 + $0x28] sm:$0xff]  ;;  %v952_v31 = vpack.c.bf16 %v426_v27, %v425_v26  ;;  %v932_v32 = vpack.c.bf16 %v123_v29, %v122_v28  ;;  %v1180_v33 = vld [vmem:[#allocation4 + $0x30] sm:$0xff]  ;;  %v428_v35 = vld [vmem:[#allocation9 + $0x38] sm:$0xff]  ;;  %86 = vst.msk [vmem:[#allocation3 + $0x30] sm:$0xff] %vm79_vm0, %v1085_v0 }
  0x3f   :  { %921 = vmatprep.subr.bf16.mxu0 %v920_v8  ;;  %343 = vadd.xlane.f32.xlu1 %v1170_v17  ;;  %v427_v34 = vld [vmem:[#allocation9 + $0x30] sm:$0xff]  ;;  %v124_v36 = vld [vmem:[#allocation7 + $0x60] sm:$0xff]  ;;  %v125_v37 = vld [vmem:[#allocation7 + $0x68] sm:$0xff]  ;;  %87 = vst.msk [vmem:[#allocation3 + $0x38] sm:$0xff] %vm79_vm0, %v1085_v0 }
  0x40   :  { %945 = vmatprep.subr.bf16.mxu1 %v944_v22  ;;  %v103_v38 = vld [vmem:[#allocation4 + $0x38] sm:$0xff]  ;;  %v956_v39 = vpack.c.bf16 %v428_v35, %v427_v34  ;;  %v936_v40 = vpack.c.bf16 %v125_v37, %v124_v36  ;;  %v104_v41 = vld [vmem:[#allocation4 + $0x40] sm:$0xff]  ;;  %v430_v43 = vld [vmem:[#allocation9 + $0x48] sm:$0xff]  ;;  %88 = vst.msk [vmem:[#allocation3 + $0x40] sm:$0xff] %vm79_vm0, %v1085_v0 }
  0x41   :  { %947 = vmatpush3.bf16.msra.mxu1 %v944_v22  ;;  %v429_v42 = vld [vmem:[#allocation9 + $0x40] sm:$0xff]  ;;  %v126_v44 = vld [vmem:[#allocation7 + $0x70] sm:$0xff]  ;;  %v127_v45 = vld [vmem:[#allocation7 + $0x78] sm:$0xff]  ;;  %89 = vst.msk [vmem:[#allocation3 + $0x48] sm:$0xff] %vm79_vm0, %v1085_v0 }
  0x42   :  { %923 = vmatpush3.bf16.msra.mxu0 %v920_v8  ;;  %345 = vadd.xlane.f32.xlu0 %v1174_v25  ;;  %v105_v46 = vld [vmem:[#allocation4 + $0x48] sm:$0xff]  ;;  %v960_v47 = vpack.c.bf16 %v430_v43, %v429_v42  ;;  %v940_v48 = vpack.c.bf16 %v127_v45, %v126_v44  ;;  %v106_v49 = vld [vmem:[#allocation4 + $0x50] sm:$0xff]  ;;  %v432_v51 = vld [vmem:[#allocation9 + $0x58] sm:$0xff]  ;;  %90 = vst.msk [vmem:[#allocation3 + $0x50] sm:$0xff] %vm79_vm0, %v1085_v0 }
  0x43   :  { %925 = vmatprep.subr.bf16.mxu0 %v924_v13  ;;  %347 = vadd.xlane.f32.xlu1 %v1176_v30  ;;  %v431_v50 = vld [vmem:[#allocation9 + $0x50] sm:$0xff]  ;;  %v107_v52 = vld [vmem:[#allocation4 + $0x58] sm:$0xff]  ;;  %v108_v54 = vld [vmem:[#allocation4 + $0x60] sm:$0xff]  ;;  %91 = vst.msk [vmem:[#allocation3 + $0x58] sm:$0xff] %vm79_vm0, %v1085_v0 }
  0x44   :  { %949 = vmatprep.subr.bf16.mxu1 %v948_v23  ;;  %v964_v53 = vpack.c.bf16 %v432_v51, %v431_v50  ;;  %v109_v55 = vld [vmem:[#allocation4 + $0x68] sm:$0xff]  ;;  %v433_v56 = vld [vmem:[#allocation9 + $0x60] sm:$0xff]  ;;  %v110_v58 = vld [vmem:[#allocation4 + $0x70] sm:$0xff]  ;;  %92 = vst.msk [vmem:[#allocation3 + $0x60] sm:$0xff] %vm79_vm0, %v1085_v0 }
  0x45   :  { %951 = vmatpush3.bf16.msra.mxu1 %v948_v23  ;;  %v434_v57 = vld [vmem:[#allocation9 + $0x68] sm:$0xff]  ;;  %v111_v60 = vld [vmem:[#allocation4 + $0x78] sm:$0xff]  ;;  %v435_v61 = vld [vmem:[#allocation9 + $0x70] sm:$0xff]  ;;  %93 = vst.msk [vmem:[#allocation3 + $0x68] sm:$0xff] %vm79_vm0, %v1085_v0 }
  0x46   :  { %927 = vmatpush3.bf16.msra.mxu0 %v924_v13  ;;  %349 = vadd.xlane.f32.xlu0 %v1180_v33  ;;  %v968_v59 = vpack.c.bf16 %v434_v57, %v433_v56  ;;  %v436_v62 = vld [vmem:[#allocation9 + $0x78] sm:$0xff]  ;;  %94 = vst.msk [vmem:[#allocation3 + $0x70] sm:$0xff] %vm79_vm0, %v1085_v0  ;;  %95 = vst.msk [vmem:[#allocation3 + $0x78] sm:$0xff] %vm79_vm0, %v1085_v0  ;;  %v321_v1 = vld [vmem:[#allocation3] sm:$0xff] }
  0x47   :  { %929 = vmatprep.subr.bf16.mxu0 %v928_v24  ;;  %351 = vadd.xlane.f32.xlu1 %v103_v38  ;;  %v972_v63 = vpack.c.bf16 %v436_v62, %v435_v61  ;;  %v323_v2 = vld [vmem:[#allocation3 + $0x10] sm:$0xff]  ;;  %v322_v6 = vld [vmem:[#allocation3 + $0x8] sm:$0xff]  ;;  %v324_v8 = vld [vmem:[#allocation3 + $0x18] sm:$0xff] }
  0x48   :  { %953 = vmatprep.subr.bf16.mxu1 %v952_v31  ;;  %v325_v14 = vld [vmem:[#allocation3 + $0x20] sm:$0xff]  ;;  %v327_v20 = vld [vmem:[#allocation3 + $0x30] sm:$0xff]  ;;  %v328_v22 = vld [vmem:[#allocation3 + $0x38] sm:$0xff] }
  0x49   :  { %955 = vmatpush3.bf16.msra.mxu1 %v952_v31  ;;  %v329_v28 = vld [vmem:[#allocation3 + $0x40] sm:$0xff]  ;;  %v330_v29 = vld [vmem:[#allocation3 + $0x48] sm:$0xff]  ;;  %v331_v34 = vld [vmem:[#allocation3 + $0x50] sm:$0xff] }
  0x4a   :  { %931 = vmatpush3.bf16.msra.mxu0 %v928_v24  ;;  %353 = vadd.xlane.f32.xlu0 %v104_v41  ;;  %v332_v36 = vld [vmem:[#allocation3 + $0x58] sm:$0xff] }
  0x4b   :  { %933 = vmatprep.subr.bf16.mxu0 %v932_v32  ;;  %355 = vadd.xlane.f32.xlu1 %v105_v46 }
  0x4c   :  { %957 = vmatprep.subr.bf16.mxu1 %v956_v39  ;;  %v334_v43 = vld [vmem:[#allocation3 + $0x68] sm:$0xff] }
  0x4d   :  { %959 = vmatpush3.bf16.msra.mxu1 %v956_v39  ;;  %v336_v51 = vld [vmem:[#allocation3 + $0x78] sm:$0xff] }
  0x4e   :  { %935 = vmatpush3.bf16.msra.mxu0 %v932_v32  ;;  %357 = vadd.xlane.f32.xlu0 %v106_v49 }
  0x4f   :  { %937 = vmatprep.subr.bf16.mxu0 %v936_v40  ;;  %359 = vadd.xlane.f32.xlu1 %v107_v52 }
  0x50   :  { %961 = vmatprep.subr.bf16.mxu1 %v960_v47 }
  0x51   :  { %963 = vmatpush3.bf16.msra.mxu1 %v960_v47 }
  0x52   :  { %939 = vmatpush3.bf16.msra.mxu0 %v936_v40  ;;  %361 = vadd.xlane.f32.xlu0 %v108_v54 }
  0x53   :  { %941 = vmatprep.subr.bf16.mxu0 %v940_v48  ;;  %363 = vadd.xlane.f32.xlu1 %v109_v55 }
  0x54   :  { %965 = vmatprep.subr.bf16.mxu1 %v964_v53 }
  0x55   :  { %967 = vmatpush3.bf16.msra.mxu1 %v964_v53 }
  0x56   :  { %943 = vmatpush3.bf16.msra.mxu0 %v940_v48  ;;  %365 = vadd.xlane.f32.xlu0 %v110_v58  ;;  %v335_v48 = vld [vmem:[#allocation3 + $0x70] sm:$0xff] }
  0x57   :  { %367 = vadd.xlane.f32.xlu1 %v111_v60  ;;  %969 = vmatprep.subr.bf16.mxu1 %v968_v59 }
  0x59   :  { %833 = vmatmul.mubr.f32.vlgmr.msra.gmra.mrb[0].mxu0 %v1168_v15  ;;  %971 = vmatpush3.bf16.msra.mxu1 %v968_v59  ;;  %v326_v15 = vld [vmem:[#allocation3 + $0x28] sm:$0xff] }
  0x5a   :  { %835 = vmatprep.mubr.f32.mxu0 %v1165_v12  ;;  %973 = vmatprep.subr.bf16.mxu1 %v972_v63 }
  0x5d   :  { %836 = vmatmul.mubr.f32.gmra.mrb[2].mxu0 %v1170_v17  ;;  %975 = vmatpush3.bf16.msra.mxu1 %v972_v63 }
  0x5e   :  { %838 = vmatprep.mubr.f32.mxu0 %v1174_v25 }
  0x61   :  { %839 = vmatmul.mubr.f32.gmra.mrb[4].mxu0 %v1176_v30 }
  0x62   :  { %841 = vmatprep.mubr.f32.mxu0 %v1180_v33 }
  0x65   :  { %842 = vmatmul.mubr.f32.gmra.mrb[6].mxu0 %v103_v38 }
  0x66   :  { %844 = vmatprep.mubr.f32.mxu0 %v104_v41  ;;  %v333_v41 = vld [vmem:[#allocation3 + $0x60] sm:$0xff] }
  0x69   :  { %845 = vmatmul.mubr.f32.gmra.mrb[8].mxu0 %v105_v46 }
  0x6a   :  { %847 = vmatprep.mubr.f32.mxu0 %v106_v49 }
  0x6d   :  { %848 = vmatmul.mubr.f32.gmra.mrb[10].mxu0 %v107_v52 }
  0x6e   :  { %850 = vmatprep.mubr.f32.mxu0 %v108_v54 }
  0x71   :  { %851 = vmatmul.mubr.f32.gmra.mrb[12].mxu0 %v109_v55 }
  0x72   :  { %853 = vmatprep.mubr.f32.mxu0 %v110_v58 }
  0x75   :  { %854 = vmatmul.mubr.f32.gmra.mrb[14].mxu0 %v111_v60 }
  0xc7   :  { %v338_v3 = vpop.xlane.xlu0 %337 }
  0xc8   :  { %v369_v4 = vadd.f32 %v338_v3, %v321_v1  ;;  %v342_v5 = vpop.xlane.xlu1 %341 }
  0xc9   :  { %v371_v7 = vadd.f32 %v342_v5, %v323_v2 }
  0xca   :  { %386 = vst.msk [vmem:[#allocation3] sm:$0xff] %vm79_vm0, %v369_v4 }
  0xcb   :  { %v340_v10 = vpop.xlane.xlu0 %339  ;;  %388 = vst.msk [vmem:[#allocation3 + $0x10] sm:$0xff] %vm79_vm0, %v371_v7 }
  0xcc   :  { %v370_v11 = vadd.f32 %v340_v10, %v322_v6  ;;  %v344_v12 = vpop.xlane.xlu1 %343 }
  0xcd   :  { %v372_v13 = vadd.f32 %v344_v12, %v324_v8 }
  0xce   :  { %387 = vst.msk [vmem:[#allocation3 + $0x8] sm:$0xff] %vm79_vm0, %v370_v11 }
  0xcf   :  { %389 = vst.msk [vmem:[#allocation3 + $0x18] sm:$0xff] %vm79_vm0, %v372_v13  ;;  %v346_v16 = vpop.xlane.xlu0 %345 }
  0xd0   :  { %v373_v17 = vadd.f32 %v346_v16, %v325_v14  ;;  %v348_v18 = vpop.xlane.xlu1 %347 }
  0xd1   :  { %v374_v19 = vadd.f32 %v348_v18, %v326_v15  ;;  %v437_v21 = vld [vmem:[#allocation3] sm:$0xff] }
  0xd2   :  { %390 = vst.msk [vmem:[#allocation3 + $0x20] sm:$0xff] %vm79_vm0, %v373_v17  ;;  %456 = vperm.xlu0 %984, %v437_v21   ;;  %v439_v30 = vld [vmem:[#allocation3 + $0x10] sm:$0xff] }
  0xd3   :  { %391 = vst.msk [vmem:[#allocation3 + $0x28] sm:$0xff] %vm79_vm0, %v374_v19  ;;  %v350_v23 = vpop.xlane.xlu0 %349 }
  0xd4   :  { %v375_v24 = vadd.f32 %v350_v23, %v327_v20  ;;  %v352_v25 = vpop.xlane.xlu1 %351 }
  0xd5   :  { %v438_v26 = vld [vmem:[#allocation3 + $0x8] sm:$0xff]  ;;  %v376_v27 = vadd.f32 %v352_v25, %v328_v22 }
  0xd6   :  { %461 = vperm.xlu1 %985, %v438_v26   ;;  %392 = vst.msk [vmem:[#allocation3 + $0x30] sm:$0xff] %vm79_vm0, %v375_v24  ;;  %v440_v37 = vld [vmem:[#allocation3 + $0x18] sm:$0xff]  ;;  %v1224_v24 = vld [vmem:[%s1260_s3] ss:$0 sm:$0xff]  ;;  %s1087_s3 = smov [#allocation10]  }
  0xd7   :  { %393 = vst.msk [vmem:[#allocation3 + $0x38] sm:$0xff] %vm79_vm0, %v376_v27  ;;  %v354_v31 = vpop.xlane.xlu0 %353  ;;  %s722_s26 = sshll.u32 %s1087_s3, 4  ;;  %s723_s26 = int_to_ptr.vmem [resolvable:$true] %s722_s26 }
  0xd8   :  { %v377_v32 = vadd.f32 %v354_v31, %v329_v28  ;;  %v356_v33 = vpop.xlane.xlu1 %355  ;;  %s1052_s29 = scalar_lea.vmem %s723_s26, 2048  ;;  %p1057_p11 = scmp.lt.s32.totalorder %s723_s26, %s723_s26 }
  0xd9   :  { %v378_v35 = vadd.f32 %v356_v33, %v330_v29  ;;  %v441_v44 = vld [vmem:[#allocation3 + $0x20] sm:$0xff]  ;;  %p1053_p10 = scmp.ne.s32.totalorder %s723_s26, %s1052_s29  ;;  %p1058_p12 = scmp.lt.s32.totalorder %s1052_s29, %s1052_s29 }
  0xda   :  { %466 = vperm.xlu1 %985, %v439_v30   ;;  %394 = vst.msk [vmem:[#allocation3 + $0x40] sm:$0xff] %vm79_vm0, %v377_v32  ;;  %v442_v52 = vld [vmem:[#allocation3 + $0x28] sm:$0xff] }
  0xdb   :  { %v358_v38 = vpop.xlane.xlu0 %357  ;;  %395 = vst.msk [vmem:[#allocation3 + $0x48] sm:$0xff] %vm79_vm0, %v378_v35  ;;  %p1059_p13 = por %p1058_p12, %p1057_p11 }
  0xdc   :  { %v379_v39 = vadd.f32 %v358_v38, %v331_v34  ;;  %v360_v40 = vpop.xlane.xlu1 %359 }
  0xdd   :  { %v380_v42 = vadd.f32 %v360_v40, %v332_v36  ;;  %v443_v58 = vld [vmem:[#allocation3 + $0x30] sm:$0xff]  ;;  %p1060_p0 = pnand %p1059_p13, %p1053_p10 }
  0xde   :  { %471 = vperm.xlu1 %985, %v440_v37   ;;  %396 = vst.msk [vmem:[#allocation3 + $0x50] sm:$0xff] %vm79_vm0, %v379_v39  ;;  %v444_v60 = vld [vmem:[#allocation3 + $0x38] sm:$0xff] }
  0xdf   :  { %v362_v45 = vpop.xlane.xlu0 %361  ;;  %397 = vst.msk [vmem:[#allocation3 + $0x58] sm:$0xff] %vm79_vm0, %v380_v42 }
  0xe0   :  { %v381_v46 = vadd.f32 %v362_v45, %v333_v41  ;;  %v364_v47 = vpop.xlane.xlu1 %363 }
  0xe1   :  { %v382_v49 = vadd.f32 %v364_v47, %v334_v43  ;;  %v445_v62 = vld [vmem:[#allocation3 + $0x40] sm:$0xff] }
  0xe2   :  { %476 = vperm.xlu1 %985, %v441_v44   ;;  %398 = vst.msk [vmem:[#allocation3 + $0x60] sm:$0xff] %vm79_vm0, %v381_v46  ;;  %v446_v50 = vld [vmem:[#allocation3 + $0x48] sm:$0xff] }
  0xe3   :  { %v366_v53 = vpop.xlane.xlu0 %365  ;;  %399 = vst.msk [vmem:[#allocation3 + $0x68] sm:$0xff] %vm79_vm0, %v382_v49  ;;  %501 = vperm.xlu0 %984, %v446_v50  }
  0xe4   :  { %v383_v54 = vadd.f32 %v366_v53, %v335_v48  ;;  %v368_v55 = vpop.xlane.xlu1 %367 }
  0xe5   :  { %v384_v56 = vadd.f32 %v368_v55, %v336_v51  ;;  %v447_v63 = vld [vmem:[#allocation3 + $0x50] sm:$0xff] }
  0xe6   :  { %481 = vperm.xlu1 %985, %v442_v52   ;;  %400 = vst.msk [vmem:[#allocation3 + $0x70] sm:$0xff] %vm79_vm0, %v383_v54  ;;  %v448_v57 = vld [vmem:[#allocation3 + $0x58] sm:$0xff] }
  0xe7   :  { %401 = vst.msk [vmem:[#allocation3 + $0x78] sm:$0xff] %vm79_vm0, %v384_v56  ;;  %511 = vperm.xlu0 %984, %v448_v57  }
  0xe9   :  { %v449_v0 = vld [vmem:[#allocation3 + $0x60] sm:$0xff] }
  0xea   :  { %486 = vperm.xlu1 %985, %v443_v58   ;;  %v450_v59 = vld [vmem:[#allocation3 + $0x68] sm:$0xff] }
  0xeb   :  { %521 = vperm.xlu0 %984, %v450_v59  }
  0xed   :  { %v451_v1 = vld [vmem:[#allocation3 + $0x70] sm:$0xff] }
  0xee   :  { %491 = vperm.xlu1 %985, %v444_v60   ;;  %v452_v61 = vld [vmem:[#allocation3 + $0x78] sm:$0xff] }
  0xef   :  { %531 = vperm.xlu0 %984, %v452_v61  }
  0xf2   :  { %496 = vperm.xlu1 %985, %v445_v62  }
  0xf6   :  { %506 = vperm.xlu1 %985, %v447_v63  }
  0xfa   :  { %516 = vperm.xlu1 %985, %v449_v0  }
  0xfe   :  { %526 = vperm.xlu1 %985, %v451_v1  }
 0x12c   :  { %v834_v2 = vpop.f32.mrb[0].mxu0 }
 0x12d   :  { %v210_v3 = vpop.f32.mrb[1].mxu0 }
 0x12e   :  { %888 = vmatprep.mubr.f32.mxu1 %v210_v3 }
 0x12f   :  { %889 = vmatmul.mubr.f32.vlgmr.msra.gmra.mrb[0].mxu1 %v834_v2 }
 0x130   :  { %v837_v4 = vpop.f32.mrb[2].mxu0 }
 0x131   :  { %v220_v5 = vpop.f32.mrb[3].mxu0 }
 0x132   :  { %891 = vmatprep.mubr.f32.mxu1 %v220_v5 }
 0x133   :  { %892 = vmatmul.mubr.f32.gmra.mrb[2].mxu1 %v837_v4 }
 0x134   :  { %v840_v6 = vpop.f32.mrb[4].mxu0 }
 0x135   :  { %v230_v7 = vpop.f32.mrb[5].mxu0 }
 0x136   :  { %894 = vmatprep.mubr.f32.mxu1 %v230_v7 }
 0x137   :  { %895 = vmatmul.mubr.f32.gmra.mrb[4].mxu1 %v840_v6 }
 0x138   :  { %v843_v8 = vpop.f32.mrb[6].mxu0 }
 0x139   :  { %v240_v9 = vpop.f32.mrb[7].mxu0 }
 0x13a   :  { %897 = vmatprep.mubr.f32.mxu1 %v240_v9 }
 0x13b   :  { %898 = vmatmul.mubr.f32.gmra.mrb[6].mxu1 %v843_v8 }
 0x13c   :  { %v846_v10 = vpop.f32.mrb[8].mxu0 }
 0x13d   :  { %v250_v11 = vpop.f32.mrb[9].mxu0 }
 0x13e   :  { %900 = vmatprep.mubr.f32.mxu1 %v250_v11 }
 0x13f   :  { %901 = vmatmul.mubr.f32.gmra.mrb[8].mxu1 %v846_v10 }
 0x140   :  { %v849_v12 = vpop.f32.mrb[10].mxu0 }
 0x141   :  { %v260_v13 = vpop.f32.mrb[11].mxu0 }
 0x142   :  { %903 = vmatprep.mubr.f32.mxu1 %v260_v13 }
 0x143   :  { %904 = vmatmul.mubr.f32.gmra.mrb[10].mxu1 %v849_v12 }
 0x144   :  { %v852_v14 = vpop.f32.mrb[12].mxu0 }
 0x145   :  { %v270_v15 = vpop.f32.mrb[13].mxu0 }
 0x146   :  { %906 = vmatprep.mubr.f32.mxu1 %v270_v15 }
 0x147   :  { %907 = vmatmul.mubr.f32.gmra.mrb[12].mxu1 %v852_v14 }
 0x148   :  { %v855_v16 = vpop.f32.mrb[14].mxu0 }
 0x149   :  { %v280_v17 = vpop.f32.mrb[15].mxu0 }
 0x14a   :  { %909 = vmatprep.mubr.f32.mxu1 %v280_v17 }
 0x14b   :  { %910 = vmatmul.mubr.f32.gmra.mrb[14].mxu1 %v855_v16 }
 0x151   :  { %v457_v25 = vpop.permute.xlu0 %456 }
 0x152   :  { %v540_v27 = vmul.f32 %v1224_v24, %v457_v25 }
 0x155   :  { %v462_v18 = vpop.permute.xlu1 %461 }
 0x156   :  { %v541_v26 = vmul.f32 %v1224_v24, %v462_v18 }
 0x159   :  { %v467_v19 = vpop.permute.xlu1 %466 }
 0x15a   :  { %v542_v34 = vmul.f32 %v1224_v24, %v467_v19 }
 0x15d   :  { %v472_v20 = vpop.permute.xlu1 %471 }
 0x15e   :  { %v543_v33 = vmul.f32 %v1224_v24, %v472_v20 }
 0x161   :  { %v477_v21 = vpop.permute.xlu1 %476 }
 0x162   :  { %v502_v38 = vpop.permute.xlu0 %501  ;;  %v544_v42 = vmul.f32 %v1224_v24, %v477_v21 }
 0x163   :  { %v549_v55 = vmul.f32 %v1224_v24, %v502_v38 }
 0x165   :  { %v482_v22 = vpop.permute.xlu1 %481 }
 0x166   :  { %v545_v40 = vmul.f32 %v1224_v24, %v482_v22  ;;  %v512_v49 = vpop.permute.xlu0 %511 }
 0x167   :  { %v551_v63 = vmul.f32 %v1224_v24, %v512_v49 }
 0x169   :  { %v487_v23 = vpop.permute.xlu1 %486 }
 0x16a   :  { %v546_v48 = vmul.f32 %v1224_v24, %v487_v23  ;;  %v522_v60 = vpop.permute.xlu0 %521 }
 0x16b   :  { %v553_v5 = vmul.f32 %v1224_v24, %v522_v60 }
 0x16d   :  { %v492_v29 = vpop.permute.xlu1 %491 }
 0x16e   :  { %v547_v47 = vmul.f32 %v1224_v24, %v492_v29  ;;  %v532_v7 = vpop.permute.xlu0 %531 }
 0x16f   :  { %v555_v13 = vmul.f32 %v1224_v24, %v532_v7 }
 0x171   :  { %v497_v41 = vpop.permute.xlu1 %496 }
 0x172   :  { %v548_v56 = vmul.f32 %v1224_v24, %v497_v41 }
 0x175   :  { %v507_v51 = vpop.permute.xlu1 %506 }
 0x176   :  { %v550_v0 = vmul.f32 %v1224_v24, %v507_v51 }
 0x179   :  { %v517_v62 = vpop.permute.xlu1 %516 }
 0x17a   :  { %v552_v6 = vmul.f32 %v1224_v24, %v517_v62 }
 0x17d   :  { %v527_v9 = vpop.permute.xlu1 %526 }
 0x17e   :  { %v554_v14 = vmul.f32 %v1224_v24, %v527_v9 }
 0x202   :  { %v890_v28 = vpop.f32.mrb[0].mxu1 }
 0x203   :  { %v628_v30 = vadd.f32 %v890_v28, %v541_v26  ;;  %v622_v31 = vpop.f32.mrb[1].mxu1 }
 0x204   :  { %v623_v32 = vadd.f32 %v622_v31, %v540_v27 }
 0x205   :  { %702 = vst [vmem:[#allocation10 + $0x8] sm:$0xff] %v628_v30 }
 0x206   :  { %701 = vst [vmem:[#allocation10] sm:$0xff] %v623_v32  ;;  %v893_v35 = vpop.f32.mrb[2].mxu1 }
 0x207   :  { %v638_v36 = vadd.f32 %v893_v35, %v543_v33  ;;  %v632_v37 = vpop.f32.mrb[3].mxu1 }
 0x208   :  { %v633_v39 = vadd.f32 %v632_v37, %v542_v34 }
 0x209   :  { %704 = vst [vmem:[#allocation10 + $0x18] sm:$0xff] %v638_v36 }
 0x20a   :  { %703 = vst [vmem:[#allocation10 + $0x10] sm:$0xff] %v633_v39  ;;  %v896_v43 = vpop.f32.mrb[4].mxu1 }
 0x20b   :  { %v648_v44 = vadd.f32 %v896_v43, %v545_v40  ;;  %v642_v45 = vpop.f32.mrb[5].mxu1 }
 0x20c   :  { %v643_v46 = vadd.f32 %v642_v45, %v544_v42 }
 0x20d   :  { %706 = vst [vmem:[#allocation10 + $0x28] sm:$0xff] %v648_v44 }
 0x20e   :  { %705 = vst [vmem:[#allocation10 + $0x20] sm:$0xff] %v643_v46  ;;  %v899_v50 = vpop.f32.mrb[6].mxu1 }
 0x20f   :  { %v658_v52 = vadd.f32 %v899_v50, %v547_v47  ;;  %v652_v53 = vpop.f32.mrb[7].mxu1 }
 0x210   :  { %v653_v54 = vadd.f32 %v652_v53, %v546_v48 }
 0x211   :  { %708 = vst [vmem:[#allocation10 + $0x38] sm:$0xff] %v658_v52 }
 0x212   :  { %707 = vst [vmem:[#allocation10 + $0x30] sm:$0xff] %v653_v54  ;;  %v902_v57 = vpop.f32.mrb[8].mxu1 }
 0x213   :  { %v668_v58 = vadd.f32 %v902_v57, %v549_v55  ;;  %v662_v59 = vpop.f32.mrb[9].mxu1 }
 0x214   :  { %v663_v61 = vadd.f32 %v662_v59, %v548_v56 }
 0x215   :  { %710 = vst [vmem:[#allocation10 + $0x48] sm:$0xff] %v668_v58 }
 0x216   :  { %709 = vst [vmem:[#allocation10 + $0x40] sm:$0xff] %v663_v61  ;;  %v905_v1 = vpop.f32.mrb[10].mxu1 }
 0x217   :  { %v678_v2 = vadd.f32 %v905_v1, %v551_v63  ;;  %v672_v3 = vpop.f32.mrb[11].mxu1 }
 0x218   :  { %v673_v4 = vadd.f32 %v672_v3, %v550_v0 }
 0x219   :  { %712 = vst [vmem:[#allocation10 + $0x58] sm:$0xff] %v678_v2 }
 0x21a   :  { %711 = vst [vmem:[#allocation10 + $0x50] sm:$0xff] %v673_v4  ;;  %v908_v8 = vpop.f32.mrb[12].mxu1 }
 0x21b   :  { %v688_v10 = vadd.f32 %v908_v8, %v553_v5  ;;  %v682_v11 = vpop.f32.mrb[13].mxu1 }
 0x21c   :  { %v683_v12 = vadd.f32 %v682_v11, %v552_v6 }
 0x21d   :  { %714 = vst [vmem:[#allocation10 + $0x68] sm:$0xff] %v688_v10 }
 0x21e   :  { %713 = vst [vmem:[#allocation10 + $0x60] sm:$0xff] %v683_v12  ;;  %v911_v15 = vpop.f32.mrb[14].mxu1 }
 0x21f   :  { %v698_v16 = vadd.f32 %v911_v15, %v555_v13  ;;  %v692_v17 = vpop.f32.mrb[15].mxu1 }
 0x220   :  { %v693_v18 = vadd.f32 %v692_v17, %v554_v14 }
 0x221   :  { %716 = vst [vmem:[#allocation10 + $0x78] sm:$0xff] %v698_v16 }
 0x222   :  { %715 = vst [vmem:[#allocation10 + $0x70] sm:$0xff] %v693_v18 }
 0x223   :  { %1063 = shalt.err (!%p1060_p0)
}
 0x224   :  { %s1064_s6 = scalar_lea.hbm %s1261_s4, 2048 }
 0x225   :  { %p1065_p1 = scmp.ne.s32.totalorder %s1261_s4, %s1064_s6  ;;  %p1068_p2 = scmp.lt.u32.totalorder %s1064_s6, %s1261_s4 }
 0x227   :  { %p1070_p3 = pnand %p1068_p2, %p1065_p1 }
 0x229   :  { %1073 = shalt.err (!%p1070_p3)
}
 0x22a   :  { %728 = dma.vmem_to_hbm [thread:$0]  %s723_s26, 2048, %s1261_s4, [#allocation6], %s1082_s27, %s1082_s27, %s1083_s28  }
 0x22b   :  { %1078 = dma.done.wait [#allocation6], 2048  }
 0x22c   :  { %1079 = vsyncadd [#allocation6], 4294965248 }
 0x22d   :  { %732 = vsyncpa [#allocation5], 1 }
 0x22e   :  { %733 = vsyncpa [#allocation8], 1 }
 0x22f   :  { %734 = vsyncpa [#allocation6], 1 }

</bundles_post_ra>
